<compile_context>
chip_gen: v6e
topology: v6e:2x2x1
jax: 0.10.0
libtpu: 0.0.40
codegen_flags: <defaults>
</compile_context>

<pallas_src>
import math
import jax
import jax.numpy as jnp
from jax.experimental import pallas as pl
from jax.experimental.pallas import tpu as pltpu


def _attention_pooling_kernel(x_ref, q_ref, o_ref, m_ref, l_ref, acc_ref):
    """x_ref: (bb, tt, e) block; q_ref: (1, e) lane-major query; o_ref: (bb, e).

    Online softmax over the t grid axis:
      m_ref   (bb, 1)  running max of scores
      l_ref   (bb, 1)  running softmax denominator
      acc_ref (bb, e)  running UNNORMALIZED weighted sum (normalized once at the end)
    """
    j = pl.program_id(1)

    @pl.when(j == 0)
    def _():
        m_ref[...] = jnp.full_like(m_ref, -jnp.inf)
        l_ref[...] = jnp.zeros_like(l_ref)
        acc_ref[...] = jnp.zeros_like(acc_ref)

    x = x_ref[...]                                   # (bb, tt, e), input dtype
    q = q_ref[...]                                   # (1, e), input dtype

    # Scores: multiply in input dtype (bf16-friendly), accumulate the e-reduce in f32.
    s = jnp.sum((x * q[jnp.newaxis, :, :]).astype(jnp.float32), axis=-1)   # (bb, tt)

    m_new = jnp.maximum(m_ref[...], jnp.max(s, axis=1, keepdims=True))     # (bb, 1)
    alpha = jnp.exp(m_ref[...] - m_new)                                    # rescale old acc
    p = jnp.exp(s - m_new)                                                 # (bb, tt), unnorm.

    l_ref[...] = alpha * l_ref[...] + jnp.sum(p, axis=1, keepdims=True)

    # Unnormalized weighted sum over this t block; multiply in input dtype, reduce in f32.
    pv = p.astype(x.dtype)
    contrib = jnp.sum((pv[:, :, jnp.newaxis] * x).astype(jnp.float32), axis=1)  # (bb, e)
    acc_ref[...] = alpha * acc_ref[...] + contrib
    m_ref[...] = m_new

    @pl.when(j == pl.num_programs(1) - 1)
    def _():
        # Deferred normalization on the (bb, e) result; reciprocal on the EUP slot.
        o_ref[...] = (acc_ref[...] * pl.reciprocal(l_ref[...], approx=True)).astype(o_ref.dtype)


def _vmem_config():
    """Per-generation (vmem_limit_bytes, chooser_budget_bytes) with explicit headroom."""
    try:
        phys = int(pltpu.get_tpu_info().vmem_capacity_bytes)
    except Exception:
        phys = 64 << 20  # conservative default (v7x-sized)
    vmem_limit = min(phys * 3 // 4, 100 << 20)      # ~48 MiB on v7x, ~96 MiB on v5e/v6e
    chooser_budget = min(phys * 2 // 5, 48 << 20)   # ~25 MiB on v7x, ~48 MiB on v5e/v6e
    return vmem_limit, chooser_budget


def _choose_blocks(b, t, e, itemsize, vmem_budget_bytes):
    """Pick (batch_block bb, seq_block tt).

    Constraints:
      * bb divides b and is a multiple of 8 OR equal to b (dense sublane output stores).
      * tt divides t and is a multiple of 8 OR equal to t ((8,128)/full-dim block rule).
      * Estimated per-step VMEM (double-buffered x/out blocks + f32 intermediates +
        accumulator scratch) fits the budget.
    Preference: >= 4 batch grid steps (>= 2 per TensorCore on v7x megacore), then the
    largest fitting tile (amortizes the ~0.35 us per-step overhead).
    """
    def tile_bytes(bb, tt):
        return (2 * bb * tt * e * itemsize        # double-buffered x blocks
                + 2 * bb * tt * e * 4             # in-kernel f32 intermediates (products/scores)
                + bb * e * 4 + 4 * bb * 4         # f32 accumulator + running max/denom scratch
                + 2 * bb * e * itemsize)          # double-buffered out blocks

    tt_cands = [t] + [tt for tt in range(8 * (t // 8), 0, -8) if tt != t and t % tt == 0]
    bb_cands = [bb for bb in range(b, 0, -1) if b % bb == 0 and (bb % 8 == 0 or bb == b)]

    best, best_key = None, None
    for tt in tt_cands:
        for bb in bb_cands:
            bytes_ = tile_bytes(bb, tt)
            if bytes_ > vmem_budget_bytes:
                continue
            key = (1 if (b // bb) >= 4 else 0, bytes_)
            if best_key is None or key > best_key:
                best, best_key = (bb, tt), key
    if best is None:
        # TODO(synk): nothing fits the budget -> smallest legal tile; relies on vmem_limit headroom.
        best = (min(bb_cands), min(tt_cands))
    return best


def attention_pooling(input_tensors, query, *, batch_block=None, seq_block=None):
    """input_tensors: (b, t, e); query: (e, 1) -> (b, e)."""
    b, t, e = input_tensors.shape
    assert query.shape == (e, 1), f"query must be (emb_in, 1), got {query.shape}"
    dtype = input_tensors.dtype
    itemsize = jnp.dtype(dtype).itemsize

    vmem_limit, budget = _vmem_config()

    # Pad the batch so multiple-of-8 batch blocks exist (dense sublane output stores).
    # Padded rows produce zeros and are sliced off below.
    b_work = b
    if batch_block is None and b > 8 and b % 8 != 0:
        b_work = ((b + 7) // 8) * 8

    bb_auto, tt_auto = _choose_blocks(b_work, t, e, itemsize, budget)
    bb = batch_block if batch_block is not None else bb_auto
    tt = seq_block if seq_block is not None else tt_auto

    assert b_work % bb == 0 and (bb % 8 == 0 or bb == b_work), \
        f"batch_block {bb} must divide {b_work} and be a multiple of 8 (or the full batch)"
    assert t % tt == 0 and (tt % 8 == 0 or tt == t), \
        f"seq_block {tt} must divide {t} and be a multiple of 8 (or the full sequence)"

    x = input_tensors
    if b_work != b:
        x = jnp.pad(input_tensors, ((0, b_work - b), (0, 0), (0, 0)))

    # Lane-major query, cast to the input dtype so the big multiplies stay narrow.
    q_row = query.reshape(1, e).astype(dtype)

    out = pl.pallas_call(
        _attention_pooling_kernel,
        out_shape=jax.ShapeDtypeStruct((b_work, e), dtype),
        grid_spec=pltpu.PrefetchScalarGridSpec(
            num_scalar_prefetch=0,
            grid=(b_work // bb, t // tt),             # reduction (t) axis last
            in_specs=[
                pl.BlockSpec((bb, tt, e), lambda i, j: (i, j, 0)),  # x block per step
                pl.BlockSpec((1, e), lambda i, j: (0, 0)),          # query resident
            ],
            out_specs=pl.BlockSpec((bb, e), lambda i, j: (i, 0)),   # resident across t axis
            scratch_shapes=[
                pltpu.VMEM((bb, 1), jnp.float32),   # running max
                pltpu.VMEM((bb, 1), jnp.float32),   # running denom
                pltpu.VMEM((bb, e), jnp.float32),   # unnormalized weighted sum
            ],
        ),
        compiler_params=pltpu.CompilerParams(
            dimension_semantics=("parallel", "arbitrary"),
            vmem_limit_bytes=vmem_limit,
        ),
    )(x, q_row)

    return out[:b] if b_work != b else out


def attention_pooling_ref(input_tensors, query):
    scores = jnp.einsum("bte,eo->bt", input_tensors, query)
    w = jax.nn.softmax(scores, axis=1)
    return jnp.einsum("bt,bte->be", w, input_tensors)


if __name__ == "__main__":
    key = jax.random.PRNGKey(0)

    # --- Small config matching the module's forward (b, t, e) ---
    b, t, e = 2, 8, 32
    k_x, k_q, k_x2, k_q2 = jax.random.split(key, 4)

    x = jax.random.normal(k_x, (b, t, e), dtype=jnp.float32)
    # Deterministic xavier_normal_ init for query of shape (emb_in, 1):
    # std = sqrt(2 / (fan_in + fan_out)) = sqrt(2 / (e + 1))
    std = math.sqrt(2.0 / (e + 1))
    query = std * jax.random.normal(k_q, (e, 1), dtype=jnp.float32)

    out = attention_pooling(x, query)
    out = jax.block_until_ready(out)
    ref = attention_pooling_ref(x, query)
    assert out.shape == (b, e)
    assert jnp.allclose(out, ref, atol=2e-3, rtol=2e-3), "mismatch vs reference (small)"

    # --- Second config exercising multi-step online softmax + batched blocks ---
    b2, t2, e2 = 16, 32, 128
    x2 = jax.random.normal(k_x2, (b2, t2, e2), dtype=jnp.float32)
    std2 = math.sqrt(2.0 / (e2 + 1))
    query2 = std2 * jax.random.normal(k_q2, (e2, 1), dtype=jnp.float32)

    out2 = attention_pooling(x2, query2, batch_block=8, seq_block=8)
    out2 = jax.block_until_ready(out2)
    ref2 = attention_pooling_ref(x2, query2)
    assert out2.shape == (b2, e2)
    assert jnp.allclose(out2, ref2, atol=2e-3, rtol=2e-3), "mismatch vs reference (tiled)"

    print("KERNEL_OK")
</pallas_src>

<mosaic_0001>
module attributes {stable_mosaic.version = 11 : i64} {
  func.func @_attention_pooling_kernel(%arg0: i32, %arg1: i32, %arg2: memref<2x8x32xf32, #tpu.memory_space<vmem>>, %arg3: memref<1x32xf32, #tpu.memory_space<vmem>>, %arg4: memref<2x32xf32, #tpu.memory_space<vmem>>, %arg5: memref<2x1xf32, #tpu.memory_space<vmem>>, %arg6: memref<2x1xf32, #tpu.memory_space<vmem>>, %arg7: memref<2x32xf32, #tpu.memory_space<vmem>>) attributes {dimension_semantics = [#tpu.dimension_semantics<parallel>, #tpu.dimension_semantics<arbitrary>], iteration_bounds = array<i64: 1, 1>, scalar_prefetch = 0 : i64, scratch_operands = 3 : i64, tpu.core_type = #tpu.core_type<tc>, window_params = [{transform_indices = @transform_0, window_bounds = array<i64: 2, 8, 32>}, {pipeline_mode = #tpu.pipeline_mode<synchronous>, transform_indices = @transform_1, window_bounds = array<i64: 1, 32>}, {transform_indices = @transform_2, window_bounds = array<i64: 2, 32>}]} {
    %c0_i32 = arith.constant 0 : i32
    %0 = arith.cmpi eq, %arg1, %c0_i32 : i32
    %1 = arith.extui %0 : i1 to i32
    %c0_i32_0 = arith.constant 0 : i32
    %2 = arith.cmpi ne, %1, %c0_i32_0 : i32
    scf.if %2 {
      %cst_24 = arith.constant 0xFF800000 : f32
      %38 = vector.broadcast %cst_24 : f32 to vector<2x1xf32>
      %c0_25 = arith.constant 0 : index
      %c0_26 = arith.constant 0 : index
      %39 = vector.load %arg5[%c0_25, %c0_26] : memref<2x1xf32, #tpu.memory_space<vmem>>, vector<2x1xf32>
      tpu.vector_store %arg5[%c0_25, %c0_26], %38 {strides = array<i32>} : memref<2x1xf32, #tpu.memory_space<vmem>>, vector<2x1xf32>,
      %cst_27 = arith.constant 0.000000e+00 : f32
      %40 = vector.broadcast %cst_27 : f32 to vector<2x1xf32>
      %c0_28 = arith.constant 0 : index
      %c0_29 = arith.constant 0 : index
      %41 = vector.load %arg6[%c0_28, %c0_29] : memref<2x1xf32, #tpu.memory_space<vmem>>, vector<2x1xf32>
      tpu.vector_store %arg6[%c0_28, %c0_29], %40 {strides = array<i32>} : memref<2x1xf32, #tpu.memory_space<vmem>>, vector<2x1xf32>,
      %cst_30 = arith.constant 0.000000e+00 : f32
      %42 = vector.broadcast %cst_30 : f32 to vector<2x32xf32>
      %c0_31 = arith.constant 0 : index
      %c0_32 = arith.constant 0 : index
      %43 = vector.load %arg7[%c0_31, %c0_32] : memref<2x32xf32, #tpu.memory_space<vmem>>, vector<2x32xf32>
      tpu.vector_store %arg7[%c0_31, %c0_32], %42 {strides = array<i32>} : memref<2x32xf32, #tpu.memory_space<vmem>>, vector<2x32xf32>,
    } else {
    }
    %c0 = arith.constant 0 : index
    %c0_1 = arith.constant 0 : index
    %c0_2 = arith.constant 0 : index
    %3 = vector.load %arg2[%c0, %c0_1, %c0_2] : memref<2x8x32xf32, #tpu.memory_space<vmem>>, vector<2x8x32xf32>
    %c0_3 = arith.constant 0 : index
    %c0_4 = arith.constant 0 : index
    %4 = vector.load %arg3[%c0_3, %c0_4] : memref<1x32xf32, #tpu.memory_space<vmem>>, vector<1x32xf32>
    %5 = vector.shape_cast %4 : vector<1x32xf32> to vector<1x1x32xf32>
    %6 = vector.broadcast %5 : vector<1x1x32xf32> to vector<2x8x32xf32>
    %7 = arith.mulf %3, %6 : vector<2x8x32xf32>
    %cst = arith.constant dense<0.000000e+00> : vector<2x8xf32>
    %8 = vector.multi_reduction <add>, %7, %cst [2] : vector<2x8x32xf32> to vector<2x8xf32>
    %c0_5 = arith.constant 0 : index
    %c0_6 = arith.constant 0 : index
    %9 = vector.load %arg5[%c0_5, %c0_6] : memref<2x1xf32, #tpu.memory_space<vmem>>, vector<2x1xf32>
    %cst_7 = arith.constant dense<0xFF800000> : vector<2xf32>
    %10 = vector.multi_reduction <maximumf>, %8, %cst_7 [1] : vector<2x8xf32> to vector<2xf32>
    %11 = vector.shape_cast %10 : vector<2xf32> to vector<2x1xf32>
    %12 = arith.maximumf %9, %11 : vector<2x1xf32>
    %c0_8 = arith.constant 0 : index
    %c0_9 = arith.constant 0 : index
    %13 = vector.load %arg5[%c0_8, %c0_9] : memref<2x1xf32, #tpu.memory_space<vmem>>, vector<2x1xf32>
    %14 = arith.subf %13, %12 : vector<2x1xf32>
    %15 = math.exp %14 : vector<2x1xf32>
    %16 = vector.broadcast %12 : vector<2x1xf32> to vector<2x8xf32>
    %17 = arith.subf %8, %16 : vector<2x8xf32>
    %18 = math.exp %17 : vector<2x8xf32>
    %c0_10 = arith.constant 0 : index
    %c0_11 = arith.constant 0 : index
    %19 = vector.load %arg6[%c0_10, %c0_11] : memref<2x1xf32, #tpu.memory_space<vmem>>, vector<2x1xf32>
    %20 = arith.mulf %15, %19 : vector<2x1xf32>
    %cst_12 = arith.constant dense<0.000000e+00> : vector<2xf32>
    %21 = vector.multi_reduction <add>, %18, %cst_12 [1] : vector<2x8xf32> to vector<2xf32>
    %22 = vector.shape_cast %21 : vector<2xf32> to vector<2x1xf32>
    %23 = arith.addf %20, %22 : vector<2x1xf32>
    %c0_13 = arith.constant 0 : index
    %c0_14 = arith.constant 0 : index
    %24 = vector.load %arg6[%c0_13, %c0_14] : memref<2x1xf32, #tpu.memory_space<vmem>>, vector<2x1xf32>
    tpu.vector_store %arg6[%c0_13, %c0_14], %23 {strides = array<i32>} : memref<2x1xf32, #tpu.memory_space<vmem>>, vector<2x1xf32>,
    %25 = vector.shape_cast %18 : vector<2x8xf32> to vector<2x8x1xf32>
    %26 = vector.broadcast %25 : vector<2x8x1xf32> to vector<2x8x32xf32>
    %27 = arith.mulf %26, %3 : vector<2x8x32xf32>
    %cst_15 = arith.constant dense<0.000000e+00> : vector<2x32xf32>
    %28 = vector.multi_reduction <add>, %27, %cst_15 [1] : vector<2x8x32xf32> to vector<2x32xf32>
    %c0_16 = arith.constant 0 : index
    %c0_17 = arith.constant 0 : index
    %29 = vector.load %arg7[%c0_16, %c0_17] : memref<2x32xf32, #tpu.memory_space<vmem>>, vector<2x32xf32>
    %30 = vector.broadcast %15 : vector<2x1xf32> to vector<2x32xf32>
    %31 = arith.mulf %30, %29 : vector<2x32xf32>
    %32 = arith.addf %31, %28 : vector<2x32xf32>
    %c0_18 = arith.constant 0 : index
    %c0_19 = arith.constant 0 : index
    %33 = vector.load %arg7[%c0_18, %c0_19] : memref<2x32xf32, #tpu.memory_space<vmem>>, vector<2x32xf32>
    tpu.vector_store %arg7[%c0_18, %c0_19], %32 {strides = array<i32>} : memref<2x32xf32, #tpu.memory_space<vmem>>, vector<2x32xf32>,
    %c0_20 = arith.constant 0 : index
    %c0_21 = arith.constant 0 : index
    %34 = vector.load %arg5[%c0_20, %c0_21] : memref<2x1xf32, #tpu.memory_space<vmem>>, vector<2x1xf32>
    tpu.vector_store %arg5[%c0_20, %c0_21], %12 {strides = array<i32>} : memref<2x1xf32, #tpu.memory_space<vmem>>, vector<2x1xf32>,
    %c0_i32_22 = arith.constant 0 : i32
    %35 = arith.cmpi eq, %arg1, %c0_i32_22 : i32
    %36 = arith.extui %35 : i1 to i32
    %c0_i32_23 = arith.constant 0 : i32
    %37 = arith.cmpi ne, %36, %c0_i32_23 : i32
    scf.if %37 {
      %c0_24 = arith.constant 0 : index
      %c0_25 = arith.constant 0 : index
      %38 = vector.load %arg7[%c0_24, %c0_25] : memref<2x32xf32, #tpu.memory_space<vmem>>, vector<2x32xf32>
      %c0_26 = arith.constant 0 : index
      %c0_27 = arith.constant 0 : index
      %39 = vector.load %arg6[%c0_26, %c0_27] : memref<2x1xf32, #tpu.memory_space<vmem>>, vector<2x1xf32>
      %40 = tpu.reciprocal %39 {approx = true} : vector<2x1xf32> -> vector<2x1xf32>
      %41 = vector.broadcast %40 : vector<2x1xf32> to vector<2x32xf32>
      %42 = arith.mulf %38, %41 : vector<2x32xf32>
      %c0_28 = arith.constant 0 : index
      %c0_29 = arith.constant 0 : index
      %43 = vector.load %arg4[%c0_28, %c0_29] : memref<2x32xf32, #tpu.memory_space<vmem>>, vector<2x32xf32>
      tpu.vector_store %arg4[%c0_28, %c0_29], %42 {strides = array<i32>} : memref<2x32xf32, #tpu.memory_space<vmem>>, vector<2x32xf32>,
    } else {
    }
    return
  }
  func.func @transform_0(%arg0: i32, %arg1: i32) -> (i32, i32, i32) {
    %c0_i32 = arith.constant 0 : i32
    %c0_i32_0 = arith.constant 0 : i32
    return %arg0, %arg1, %c0_i32 : i32, i32, i32
  }
  func.func @transform_1(%arg0: i32, %arg1: i32) -> (i32, i32) {
    %c0_i32 = arith.constant 0 : i32
    %c0_i32_0 = arith.constant 0 : i32
    %c0_i32_1 = arith.constant 0 : i32
    return %c0_i32, %c0_i32_0 : i32, i32
  }
  func.func @transform_2(%arg0: i32, %arg1: i32) -> (i32, i32) {
    %c0_i32 = arith.constant 0 : i32
    %c0_i32_0 = arith.constant 0 : i32
    return %arg0, %c0_i32 : i32, i32
  }
}

</mosaic_0001>

<bundles_post_ra>
// kernel: tpu_custom_call.1
= control target key start
LH: loop header
LB: loop body
LE: loop exit
PB: predicated region body
PF: predicated region fallthrough
CT: control target
= control target key end

     0   :  { %7 = vsyncpa [#allocation6], 0  ;;  %s293_s0 = inlined_call_operand.hbm [shape: f32[2,8,32], index: 0, kind: input, shape index: {}]   ;;  %s294_s1 = inlined_call_operand.vmem [shape: f32[1,32], index: 1, kind: input, shape index: {}]   ;;  %s295_s2 = inlined_call_operand.hbm [shape: f32[2,32], index: 2, kind: output, shape index: {}]  }
   0x1   :  { %8 = vsyncpa [#allocation7], 0  ;;  %s246_s9 = smov [#allocation5]  }
   0x2   :  { %s14_s10 = sshll.u32 %s246_s9, 4  ;;  %s15_s10 = int_to_ptr.vmem [resolvable:$true] %s14_s10 }
   0x3   :  { %s210_s11 = scalar_lea.vmem %s15_s10, 256  ;;  %p215_p1 = scmp.lt.s32.totalorder %s15_s10, %s15_s10 }
   0x4   :  { %p211_p0 = scmp.ne.s32.totalorder %s15_s10, %s210_s11  ;;  %p216_p2 = scmp.lt.s32.totalorder %s210_s11, %s210_s11 }
   0x6   :  { %p217_p3 = por %p216_p2, %p215_p1 }
   0x8   :  { %p218_p4 = pnand %p217_p3, %p211_p0 }
   0xa   :  { %221 = shalt.err (!%p218_p4)
}
   0xb   :  { %s247_s12 = smov 128   ;;  %s248_s13 = smov 8  }
   0xc   :  { %20 = dma.hbm_to_vmem [thread:$0]  %s293_s0, 256, %s15_s10, [#allocation6], %s247_s12, %s247_s12, %s248_s13  }
   0xd   :  { %242 = dma.done.wait [#allocation6], 256  }
   0xe   :  { %243 = vsyncadd [#allocation6], 4294967040  ;;  %v35_v0 = vld [vmem:[#allocation5] sm:$0xff]  ;;  %v184_v1 = vld [vmem:[%s294_s1] ss:$0 sm:$0xff]  ;;  %vm46_vm0 = vcmask 261120   ;;  %v56_v8 = vlaneseq }
   0xf   :  { %v36_v2 = vld [vmem:[#allocation5 + $0x8] sm:$0xff]  ;;  %v44_v3 = vmul.f32 %v184_v1, %v35_v0  ;;  %vm30_vm1 = vcmask 1024   ;;  %v249_v7 = vmov -inf   ;;  %vm66_vm2 = vcmask 1041409   ;;  %s252_s0 = smov [#allocation8]  }
  0x10   :  { %v45_v4 = vmul.f32 %v184_v1, %v36_v2  ;;  %31 = vst.msk [vmem:[#allocation2] sm:$0x3] %vm30_vm1, %v249_v7  ;;  %v57_v9 = vand.u32 127, %v56_v8  ;;  %v59_v10 = vshrl.u32 %v56_v8, 7  ;;  %vm69_vm3 = vcmask 58368   ;;  %s175_s1 = sshll.u32 %s252_s0, 4  ;;  %s176_s1 = int_to_ptr.vmem [resolvable:$true] %s175_s1 }
  0x11   :  { %v47_v5 = vsel %vm46_vm0, %v44_v3, 0.0  ;;  %v250_v18 = vmov 0   ;;  %v251_v19 = vmov 0.0   ;;  %vm33_vm4 = vcmask 254976   ;;  %s222_s18 = scalar_lea.vmem %s176_s1, 32  ;;  %p227_p6 = scmp.lt.s32.totalorder %s176_s1, %s176_s1 }
  0x12   :  { %48 = vadd.xlane.f32.xlu0 %v47_v5  ;;  %v50_v6 = vsel %vm46_vm0, %v45_v4, 0.0  ;;  %v60_v12 = vsub.s32 %v57_v9, %v59_v10  ;;  %192 = vset.pattern.permute.xlu1 %v250_v18  ;;  %32 = vst.msk [vmem:[#allocation3] sm:$0x3] %vm30_vm1, %v251_v19  ;;  %v83_v24 = vsub.s32 0, %v59_v10  ;;  %v87_v25 = vsub.s32 1, %v59_v10  ;;  %p223_p5 = scmp.ne.s32.totalorder %s176_s1, %s222_s18  ;;  %p228_p7 = scmp.lt.s32.totalorder %s222_s18, %s222_s18 }
  0x13   :  { %193 = vset.pattern.permute.xlu0 %v250_v18  ;;  %34 = vst.msk [vmem:[#allocation4] sm:$0x3] %vm33_vm4, %v251_v19 }
  0x14   :  { %p229_p8 = por %p228_p7, %p227_p6 }
  0x16   :  { %51 = vadd.xlane.f32.xlu0 %v50_v6  ;;  %p230_p9 = pnand %p229_p8, %p223_p5 }
  0x17   :  { %v53_v20 = vld [vmem:[#allocation2] sm:$0x3] }
  0x1a   :  { %v141_v57 = vld [vmem:[#allocation4] sm:$0x3] }
  0x9b   :  { %v49_v11 = vpop.xlane.xlu0 %48 }
  0x9c   :  { %v61_v14 = vrot.slane %v49_v11, %v60_v12 }
  0x9f   :  { %v52_v13 = vpop.xlane.xlu0 %51 }
  0xa0   :  { %v65_v15 = vrot.slane %v52_v13, %v60_v12 }
  0xa2   :  { %v67_v16 = vsel %vm66_vm2, %v65_v15, %v61_v14 }
  0xa3   :  { %v70_v17 = vsel %vm69_vm3, %v67_v16, -inf }
  0xa4   :  { %71 = vmax.xlane.f32.xlu1 %v70_v17 }
 0x12d   :  { %v72_v21 = vpop.xlane.xlu1 %71 }
 0x12e   :  { %v73_v22 = vmax.f32 %v53_v20, %v72_v21 }
 0x130   :  { %v74_v23 = vsub.f32 %v53_v20, %v73_v22  ;;  %155 = vst.msk [vmem:[#allocation2] sm:$0x3] %vm30_vm1, %v73_v22  ;;  %79 = vperm.xlu1 %192, %v73_v22  }
 0x132   :  { %v75_v33 = vmul.f32 1.442695, %v74_v23 }
 0x1ab   :  { %v80_v26 = vpop.permute.xlu1 %79 }
 0x1ac   :  { %v84_v27 = vrot.slane %v80_v26, %v83_v24  ;;  %v88_v28 = vrot.slane %v80_v26, %v87_v25 }
 0x1ae   :  { %v91_v29 = vsub.f32 %v49_v11, %v84_v27  ;;  %v92_v30 = vsub.f32 %v52_v13, %v88_v28 }
 0x1b0   :  { %v93_v31 = vmul.f32 1.442695, %v91_v29  ;;  %v95_v32 = vmul.f32 1.442695, %v92_v30 }
 0x1b2   :  { %194 = vpow2.f32 %v93_v31 }
 0x1b3   :  { %196 = vpow2.f32 %v95_v32 }
 0x1b4   :  { %198 = vpow2.f32 %v75_v33 }
 0x1bf   :  { %v195_v34 = vpop.eup %194 }
 0x1c0   :  { %v197_v35 = vpop.eup %196  ;;  %102 = vperm.xlu0 %193, %v195_v34  }
 0x1c1   :  { %105 = vperm.xlu1 %192, %v197_v35   ;;  %v199_v36 = vpop.eup %198 }
 0x1c4   :  { %144 = vperm.xlu0 %193, %v199_v36  }
 0x23b   :  { %v103_v37 = vpop.permute.xlu0 %102 }
 0x23c   :  { %v106_v38 = vpop.permute.xlu1 %105  ;;  %v110_v39 = vrot.slane %v103_v37, %v60_v12  ;;  %v125_v40 = vmul.f32 %v103_v37, %v35_v0  ;;  %v97_v0 = vld [vmem:[#allocation3] sm:$0x3] }
 0x23d   :  { %v114_v41 = vrot.slane %v106_v38, %v60_v12  ;;  %v126_v42 = vmul.f32 %v106_v38, %v36_v2  ;;  %v98_v1 = vmul.f32 %v199_v36, %v97_v0 }
 0x23e   :  { %v127_v43 = vsel %vm46_vm0, %v125_v40, 0.0 }
 0x23f   :  { %v134_v44 = vsel %vm46_vm0, %v126_v42, 0.0  ;;  %v128_v45 = vrot.slane %v127_v43, 4  ;;  %v115_v46 = vsel %vm66_vm2, %v114_v41, %v110_v39  ;;  %v145_v58 = vpop.permute.xlu0 %144 }
 0x240   :  { %v135_v47 = vrot.slane %v134_v44, 4  ;;  %v117_v48 = vsel %vm69_vm3, %v115_v46, 0.0  ;;  %v147_v61 = vmul.f32 %v145_v58, %v141_v57 }
 0x241   :  { %v129_v49 = vadd.f32 %v128_v45, %v127_v43  ;;  %118 = vadd.xlane.f32.xlu1 %v117_v48 }
 0x242   :  { %v136_v50 = vadd.f32 %v135_v47, %v134_v44 }
 0x243   :  { %v130_v51 = vrot.slane %v129_v49, 2 }
 0x244   :  { %v137_v52 = vrot.slane %v136_v50, 2 }
 0x245   :  { %v131_v53 = vadd.f32 %v130_v51, %v129_v49 }
 0x246   :  { %v138_v54 = vadd.f32 %v137_v52, %v136_v50 }
 0x247   :  { %v132_v55 = vrot.slane %v131_v53, 1 }
 0x248   :  { %v139_v56 = vrot.slane %v138_v54, 1 }
 0x249   :  { %v133_v59 = vadd.f32 %v132_v55, %v131_v53 }
 0x24a   :  { %v140_v60 = vadd.f32 %v139_v56, %v138_v54 }
 0x24c   :  { %v150_v62 = vsel %vm66_vm2, %v140_v60, %v133_v59 }
 0x24d   :  { %v152_v63 = vadd.f32 %v150_v62, %v147_v61 }
 0x24f   :  { %154 = vst.msk [vmem:[#allocation4] sm:$0x3] %vm33_vm4, %v152_v63 }
 0x256   :  { %v159_v6 = vld [vmem:[#allocation4] sm:$0x3] }
 0x2ca   :  { %v119_v2 = vpop.xlane.xlu1 %118 }
 0x2cb   :  { %v120_v3 = vadd.f32 %v119_v2, %v98_v1 }
 0x2cd   :  { %122 = vst.msk [vmem:[#allocation3] sm:$0x3] %vm30_vm1, %v120_v3 }
 0x2d4   :  { %v160_v4 = vld [vmem:[#allocation3] sm:$0x3] }
 0x2d5   :  { %200 = vrcp.f32 %v160_v4 }
 0x2e2   :  { %v201_v5 = vpop.eup %200 }
 0x2e3   :  { %164 = vperm.xlu0 %193, %v201_v5  }
 0x35e   :  { %v165_v7 = vpop.permute.xlu0 %164 }
 0x35f   :  { %v167_v8 = vmul.f32 %v165_v7, %v159_v6 }
 0x361   :  { %168 = vst.msk [vmem:[#allocation8] sm:$0x3] %vm33_vm4, %v167_v8 }
 0x362   :  { %233 = shalt.err (!%p230_p9)
}
 0x363   :  { %178 = dma.vmem_to_hbm [thread:$0]  %s176_s1, 32, %s295_s2, [#allocation7]  }
 0x364   :  { %244 = dma.done.wait [#allocation7], 32  }
 0x365   :  { %245 = vsyncadd [#allocation7], 4294967264 }
 0x366   :  { %182 = vsyncpa [#allocation6], 1 }
 0x367   :  { %183 = vsyncpa [#allocation7], 1 }

</bundles_post_ra>
